<compile_context>
chip_gen: v7x
topology: tpu7x:2x2x1
jax: 0.10.0
libtpu: 0.0.40
codegen_flags: <defaults>
</compile_context>

<pallas_src>
import functools

import jax
import jax.numpy as jnp
from jax.experimental import pallas as pl
from jax.experimental.pallas import tpu as pltpu

# ---- DfkdeModel.__init__ defaults ------------------------------------------
N_COMPS = 16                 # n_comps
PRE_PROCESSING = "scale"     # pre_processing
THRESHOLD_STEEPNESS = 0.05   # threshold_steepness
THRESHOLD_OFFSET = 12.0      # threshold_offset

LANE = 128
_VMEM_LIMIT = 32 * 1024 * 1024   # safe on v5e/v6e (128 MiB) and v7x (64 MiB)


def _round_up(x, m):
    return ((x + m - 1) // m) * m


# =============================== Pallas kernels ==============================
def _feature_kernel(x_ref, w_ref, b_ref, o_ref, acc_ref, *, n_patches):
    """Backbone (patch-embed matmul + ReLU) + adaptive_avg_pool2d((1,1)).

    Grid: (B_tiles ["parallel"], P_tiles ["arbitrary"]).
    x_ref: (TB, TP, F_pad) bf16 image patches (tile)
    w_ref: (F_pad, D_pad)  bf16 backbone weight (resident)
    b_ref: (1, D_pad)      f32  backbone bias
    o_ref: (TB, D_pad)     f32  pooled feature vectors (written at last P tile)
    acc_ref: (TB, D_pad)   f32  VMEM accumulator across the patch axis
    """
    p = pl.program_id(1)

    @pl.when(p == 0)
    def _init():
        acc_ref[...] = jnp.zeros_like(acc_ref)

    tb, tp, f = x_ref.shape
    d = w_ref.shape[1]
    # Flatten (TB, TP, F) -> (TB*TP, F): one big-M MXU matmul, bf16 in / f32 acc.
    x2 = x_ref[...].reshape(tb * tp, f)
    h = jnp.dot(x2, w_ref[...], preferred_element_type=jnp.float32)
    h = jnp.maximum(h + b_ref[...], 0.0)                       # bias + ReLU (f32)
    acc_ref[...] += jnp.sum(h.reshape(tb, tp, d), axis=1)

    @pl.when(p == pl.num_programs(1) - 1)
    def _finalize():
        # adaptive_avg_pool2d((1,1)) + .view(B, -1): mean over all true patches.
        o_ref[...] = acc_ref[...] * (1.0 / n_patches)


def _dfkde_score_kernel(feat_ref, m_ref, off_ref, dT_ref, dsq_ref, c_ref,
                        o_ref, acc_ref):
    """PCA.transform -> pre_process('scale') -> GaussianKDE -> log -> prob.

    Grid: (N_tiles ["arbitrary"]).
    feat_ref: (B, D_pad)    pooled CNN features (padded cols are 0)
    m_ref:    (D_pad, K_pad) folded (pca_comps @ bw) / max_length
    off_ref:  (1, K_pad)    folded pca_mean @ M
    dT_ref:   (K_pad, TN)   bandwidth-transformed training embeddings, transposed
    dsq_ref:  (1, TN)       ||d||^2 per training embedding (pad entries = 1e30)
    c_ref:    (1, 128)      kde_norm / N_true, lane-broadcast
    o_ref:    (B, 128)      anomaly probability, broadcast across lanes
    acc_ref:  (B, 128)      running sum of exp(-0.5*dist) over N tiles
    """
    n = pl.program_id(0)

    @pl.when(n == 0)
    def _init():
        acc_ref[...] = jnp.zeros_like(acc_ref)

    # Folded front end: g = ((feat - mean) @ comps / max_length) @ bw
    g = jnp.dot(feat_ref[...], m_ref[...],
                preferred_element_type=jnp.float32) - off_ref[...]     # (B, K)
    gsq = jnp.sum(g * g, axis=-1, keepdims=True)                       # (B, 1)

    # ||d-g||^2 = ||d||^2 + ||g||^2 - 2 g.d^T  (MXU Gram matmul, clamped >= 0)
    cross = jnp.dot(g, dT_ref[...], preferred_element_type=jnp.float32)  # (B, TN)
    dist = jnp.maximum(dsq_ref[...] + gsq - 2.0 * cross, 0.0)
    acc_ref[...] += jnp.sum(jnp.exp(-0.5 * dist), axis=-1, keepdims=True)

    @pl.when(n == pl.num_programs(0) - 1)
    def _finalize():
        # GaussianKDE: est = kde_norm * mean(exp(-0.5*dist))
        est = acc_ref[...] * c_ref[...]
        # compute_kde_scores(as_log_likelihood=True); `+1e-300` underflows to 0
        # in f32 (parity with torch f32) -> est==0 gives -inf -> prob saturates 1.
        scores = jnp.log(est + 1e-300)
        # compute_probabilities: 1 / (1 + exp(steepness * (score - offset)))
        o_ref[...] = 1.0 / (1.0 + jnp.exp(
            THRESHOLD_STEEPNESS * (scores - THRESHOLD_OFFSET)))


# =============================== wrappers ====================================
def extract_features(x_nchw, w_bb, b_bb, patch=4):
    """DfkdeModel.get_features(): backbone + global avg pool (tiled Pallas)."""
    B, C, H, W = x_nchw.shape
    F_in, D = w_bb.shape
    assert H % patch == 0 and W % patch == 0 and F_in == C * patch * patch
    P = (H // patch) * (W // patch)
    F_pad = _round_up(F_in, LANE)
    D_pad = _round_up(D, LANE)

    # NCHW -> (B, P, F_in) patches (pure layout glue), zero-pad F, cast bf16.
    x = x_nchw.reshape(B, C, H // patch, patch, W // patch, patch)
    x = jnp.transpose(x, (0, 2, 4, 1, 3, 5)).reshape(B, P, F_in)
    x = jnp.pad(x, ((0, 0), (0, 0), (0, F_pad - F_in))).astype(jnp.bfloat16)
    w = jnp.pad(w_bb, ((0, F_pad - F_in), (0, D_pad - D))).astype(jnp.bfloat16)
    b = jnp.pad(b_bb, (0, D_pad - D)).reshape(1, D_pad).astype(jnp.float32)

    tb = B if B < 8 else 8
    assert B % tb == 0, "batch must be a multiple of the batch tile"
    if P % 16 == 0:
        tp = 16
    elif P % 8 == 0:
        tp = 8
    else:
        tp = P
    grid = (B // tb, P // tp)

    kernel = functools.partial(_feature_kernel, n_patches=float(P))
    feats = pl.pallas_call(
        kernel,
        out_shape=jax.ShapeDtypeStruct((B, D_pad), jnp.float32),
        grid_spec=pltpu.PrefetchScalarGridSpec(
            num_scalar_prefetch=0,
            grid=grid,
            in_specs=[
                pl.BlockSpec((tb, tp, F_pad), lambda i, p: (i, p, 0)),
                pl.BlockSpec((F_pad, D_pad), lambda i, p: (0, 0)),
                pl.BlockSpec((1, D_pad), lambda i, p: (0, 0)),
            ],
            out_specs=pl.BlockSpec((tb, D_pad), lambda i, p: (i, 0)),
            scratch_shapes=[pltpu.VMEM((tb, D_pad), jnp.float32)],
        ),
        compiler_params=pltpu.CompilerParams(
            dimension_semantics=("parallel", "arbitrary"),
            vmem_limit_bytes=_VMEM_LIMIT,
        ),
    )(x, w, b)
    return feats  # (B, D_pad); columns >= D are exactly zero.


def dfkde_predict(features, fit_state):
    """DfkdeModel.predict(): PCA + scale + KDE + log + probability (Pallas)."""
    B, D_pad = features.shape
    M, off, dT, dsq, c = fit_state
    K_pad, N_pad = dT.shape
    tn = min(N_pad, 512)
    assert N_pad % tn == 0 and tn % LANE == 0

    out = pl.pallas_call(
        _dfkde_score_kernel,
        out_shape=jax.ShapeDtypeStruct((B, LANE), jnp.float32),
        grid_spec=pltpu.PrefetchScalarGridSpec(
            num_scalar_prefetch=0,
            grid=(N_pad // tn,),
            in_specs=[
                pl.BlockSpec((B, D_pad), lambda n: (0, 0)),      # features
                pl.BlockSpec((D_pad, K_pad), lambda n: (0, 0)),  # folded M
                pl.BlockSpec((1, K_pad), lambda n: (0, 0)),      # folded offset
                pl.BlockSpec((K_pad, tn), lambda n: (0, n)),     # dataset^T tile
                pl.BlockSpec((1, tn), lambda n: (0, n)),         # ||d||^2 tile
                pl.BlockSpec((1, LANE), lambda n: (0, 0)),       # kde_norm / N
            ],
            out_specs=pl.BlockSpec((B, LANE), lambda n: (0, 0)),
            scratch_shapes=[pltpu.VMEM((B, LANE), jnp.float32)],
        ),
        compiler_params=pltpu.CompilerParams(
            dimension_semantics=("arbitrary",),
            vmem_limit_bytes=_VMEM_LIMIT,
        ),
    )(features, M, off, dT, dsq, c)
    return out[:, 0]  # probabilities, shape (B,)


def dfkde_forward(batch, w_bb, b_bb, fit_state, patch=4):
    """DfkdeModel.forward(batch) -> anomaly probabilities, shape (B,)."""
    feature_vector = extract_features(batch, w_bb, b_bb, patch=patch)   # (B, D_pad)
    # feature_vector.view(feature_vector.shape[:2]) is a no-op on (B, D).
    return dfkde_predict(feature_vector, fit_state)


# ---- fit-time state (plain JAX glue; mirrors anomalib PCA.fit / KDE.fit) ----
def fit_dfkde(train_features, n_components=N_COMPS):
    f = train_features.astype(jnp.float32)
    # PCA.fit (padded feature columns are exactly 0 -> identical components).
    mean = jnp.mean(f, axis=0)
    centered = f - mean
    _, _, vh = jnp.linalg.svd(centered, full_matrices=False)
    comps = vh[:n_components].T                                 # (D_pad, K)
    proj = centered @ comps                                     # (N, K)
    # pre_process(mode="scale")
    max_length = jnp.max(jnp.linalg.norm(proj, axis=1))
    feats = proj / max_length
    # GaussianKDE.fit (Scott's bandwidth factor)
    n, dim = feats.shape
    factor = n ** (-1.0 / (dim + 4))
    cov = jnp.cov(feats.T) + 1e-6 * jnp.eye(dim, dtype=jnp.float32)
    inv_cov = jnp.linalg.inv(cov) / (factor ** 2)
    bw = jnp.linalg.cholesky(inv_cov)                           # lower-triangular
    dataset = feats @ bw                                        # (N, K)
    kde_norm = jnp.prod(jnp.diag(bw)) * (2.0 * jnp.pi) ** (-dim / 2.0)

    # Fold PCA projection + 1/max_length + bandwidth into one matrix / offset.
    M = (comps @ bw) / max_length                               # (D_pad, K)
    off = (mean @ M).reshape(1, -1)                             # (1, K)

    # Lane-dense padding + transposed dataset + precomputed ||d||^2.
    D_pad, K = M.shape
    K_pad = _round_up(K, LANE)
    N_pad = _round_up(n, LANE)
    M_p = jnp.pad(M, ((0, 0), (0, K_pad - K))).astype(jnp.float32)
    off_p = jnp.pad(off, ((0, 0), (0, K_pad - K))).astype(jnp.float32)
    dT = jnp.pad(dataset.T, ((0, K_pad - K), (0, N_pad - n))).astype(jnp.float32)
    dsq = jnp.sum(dataset * dataset, axis=1)
    dsq_p = jnp.pad(dsq, (0, N_pad - n),
                    constant_values=1e30).reshape(1, N_pad).astype(jnp.float32)
    c = (kde_norm / n) * jnp.ones((1, LANE), jnp.float32)       # mean + kde_norm
    return (M_p, off_p, dT, dsq_p, c)


# =============================== demo ========================================
if __name__ == "__main__":
    key = jax.random.PRNGKey(0)
    k_w, k_b, k_train, k_test = jax.random.split(key, 4)

    B, C, H, W = 2, 4, 32, 32
    PATCH = 4
    D_FEAT = 32
    N_TRAIN = 256                       # 2 N-tiles of 128 in the scoring kernel
    F_IN = C * PATCH * PATCH            # 64 -> padded to 128 for the MXU

    # Deterministic synthetic backbone parameters.
    w_bb = (jax.random.normal(k_w, (F_IN, D_FEAT), jnp.float32)
            / jnp.sqrt(jnp.float32(F_IN)))
    b_bb = 0.1 * jax.random.normal(k_b, (D_FEAT,), jnp.float32)

    # "Training" images -> features (Pallas) -> PCA/KDE fit (JAX glue).
    train_imgs = jax.random.normal(k_train, (N_TRAIN, C, H, W), jnp.float32)
    train_feats = extract_features(train_imgs, w_bb, b_bb, patch=PATCH)
    fit_state = fit_dfkde(train_feats, N_COMPS)

    # Forward pass on a small test batch.
    x = jax.random.normal(k_test, (B, C, H, W), jnp.float32)
    probs = dfkde_forward(x, w_bb, b_bb, fit_state, patch=PATCH)
    probs = jax.block_until_ready(probs)

    assert probs.shape == (B,)
    assert bool(jnp.all(jnp.isfinite(probs)))
    assert bool(jnp.all((probs >= 0.0) & (probs <= 1.0)))
    print("KERNEL_OK")
</pallas_src>

<mosaic_0001>
module attributes {stable_mosaic.version = 11 : i64} {
  func.func @_feature_kernel(%arg0: i32, %arg1: i32, %arg2: memref<8x16x128xbf16, #tpu.memory_space<vmem>>, %arg3: memref<128x128xbf16, #tpu.memory_space<vmem>>, %arg4: memref<1x128xf32, #tpu.memory_space<vmem>>, %arg5: memref<8x128xf32, #tpu.memory_space<vmem>>, %arg6: memref<8x128xf32, #tpu.memory_space<vmem>>) attributes {dimension_semantics = [#tpu.dimension_semantics<parallel>, #tpu.dimension_semantics<arbitrary>], iteration_bounds = array<i64: 32, 4>, scalar_prefetch = 0 : i64, scratch_operands = 1 : i64, tpu.core_type = #tpu.core_type<tc>, window_params = [{transform_indices = @transform_0, window_bounds = array<i64: 8, 16, 128>}, {pipeline_mode = #tpu.pipeline_mode<synchronous>, transform_indices = @transform_1, window_bounds = array<i64: 128, 128>}, {pipeline_mode = #tpu.pipeline_mode<synchronous>, transform_indices = @transform_2, window_bounds = array<i64: 1, 128>}, {transform_indices = @transform_3, window_bounds = array<i64: 8, 128>}]} {
    %c0_i32 = arith.constant 0 : i32
    %0 = arith.cmpi eq, %arg1, %c0_i32 : i32
    %1 = arith.extui %0 : i1 to i32
    %c0_i32_0 = arith.constant 0 : i32
    %2 = arith.cmpi ne, %1, %c0_i32_0 : i32
    scf.if %2 {
      %cst_14 = arith.constant 0.000000e+00 : f32
      %20 = vector.broadcast %cst_14 : f32 to vector<8x128xf32>
      %c0_15 = arith.constant 0 : index
      %c0_16 = arith.constant 0 : index
      %21 = vector.load %arg6[%c0_15, %c0_16] : memref<8x128xf32, #tpu.memory_space<vmem>>, vector<8x128xf32>
      tpu.vector_store %arg6[%c0_15, %c0_16], %20 {strides = array<i32>} : memref<8x128xf32, #tpu.memory_space<vmem>>, vector<8x128xf32>,
    } else {
    }
    %c0 = arith.constant 0 : index
    %c0_1 = arith.constant 0 : index
    %c0_2 = arith.constant 0 : index
    %3 = vector.load %arg2[%c0, %c0_1, %c0_2] : memref<8x16x128xbf16, #tpu.memory_space<vmem>>, vector<8x16x128xbf16>
    %4 = vector.shape_cast %3 : vector<8x16x128xbf16> to vector<128x128xbf16>
    %c0_3 = arith.constant 0 : index
    %c0_4 = arith.constant 0 : index
    %5 = vector.load %arg3[%c0_3, %c0_4] : memref<128x128xbf16, #tpu.memory_space<vmem>>, vector<128x128xbf16>
    %cst = arith.constant dense<0.000000e+00> : vector<128x128xf32>
    %6 = tpu.matmul %4, %5, %cst {dimension_numbers = #tpu.dot_dimension_numbers<[1], [0], [0], [1], [0, 0, 1, 1], [], []>} : vector<128x128xbf16>, vector<128x128xbf16>, vector<128x128xf32> -> vector<128x128xf32>
    %c0_5 = arith.constant 0 : index
    %c0_6 = arith.constant 0 : index
    %7 = vector.load %arg4[%c0_5, %c0_6] : memref<1x128xf32, #tpu.memory_space<vmem>>, vector<1x128xf32>
    %8 = vector.broadcast %7 : vector<1x128xf32> to vector<128x128xf32>
    %9 = arith.addf %6, %8 : vector<128x128xf32>
    %cst_7 = arith.constant 0.000000e+00 : f32
    %10 = vector.broadcast %cst_7 : f32 to vector<128x128xf32>
    %11 = arith.maximumf %9, %10 : vector<128x128xf32>
    %c0_8 = arith.constant 0 : index
    %c0_9 = arith.constant 0 : index
    %12 = vector.load %arg6[%c0_8, %c0_9] : memref<8x128xf32, #tpu.memory_space<vmem>>, vector<8x128xf32>
    %13 = vector.shape_cast %11 : vector<128x128xf32> to vector<8x16x128xf32>
    %cst_10 = arith.constant dense<0.000000e+00> : vector<8x128xf32>
    %14 = vector.multi_reduction <add>, %13, %cst_10 [1] : vector<8x16x128xf32> to vector<8x128xf32>
    %15 = arith.addf %12, %14 : vector<8x128xf32>
    %c0_11 = arith.constant 0 : index
    %c0_12 = arith.constant 0 : index
    %16 = vector.load %arg6[%c0_11, %c0_12] : memref<8x128xf32, #tpu.memory_space<vmem>>, vector<8x128xf32>
    tpu.vector_store %arg6[%c0_11, %c0_12], %15 {strides = array<i32>} : memref<8x128xf32, #tpu.memory_space<vmem>>, vector<8x128xf32>,
    %c3_i32 = arith.constant 3 : i32
    %17 = arith.cmpi eq, %arg1, %c3_i32 : i32
    %18 = arith.extui %17 : i1 to i32
    %c0_i32_13 = arith.constant 0 : i32
    %19 = arith.cmpi ne, %18, %c0_i32_13 : i32
    scf.if %19 {
      %c0_14 = arith.constant 0 : index
      %c0_15 = arith.constant 0 : index
      %20 = vector.load %arg6[%c0_14, %c0_15] : memref<8x128xf32, #tpu.memory_space<vmem>>, vector<8x128xf32>
      %cst_16 = arith.constant 1.562500e-02 : f32
      %21 = vector.broadcast %cst_16 : f32 to vector<8x128xf32>
      %22 = arith.mulf %20, %21 : vector<8x128xf32>
      %c0_17 = arith.constant 0 : index
      %c0_18 = arith.constant 0 : index
      %23 = vector.load %arg5[%c0_17, %c0_18] : memref<8x128xf32, #tpu.memory_space<vmem>>, vector<8x128xf32>
      tpu.vector_store %arg5[%c0_17, %c0_18], %22 {strides = array<i32>} : memref<8x128xf32, #tpu.memory_space<vmem>>, vector<8x128xf32>,
    } else {
    }
    return
  }
  func.func @transform_0(%arg0: i32, %arg1: i32) -> (i32, i32, i32) {
    %c0_i32 = arith.constant 0 : i32
    %c0_i32_0 = arith.constant 0 : i32
    return %arg0, %arg1, %c0_i32 : i32, i32, i32
  }
  func.func @transform_1(%arg0: i32, %arg1: i32) -> (i32, i32) {
    %c0_i32 = arith.constant 0 : i32
    %c0_i32_0 = arith.constant 0 : i32
    %c0_i32_1 = arith.constant 0 : i32
    return %c0_i32, %c0_i32_0 : i32, i32
  }
  func.func @transform_2(%arg0: i32, %arg1: i32) -> (i32, i32) {
    %c0_i32 = arith.constant 0 : i32
    %c0_i32_0 = arith.constant 0 : i32
    %c0_i32_1 = arith.constant 0 : i32
    return %c0_i32, %c0_i32_0 : i32, i32
  }
  func.func @transform_3(%arg0: i32, %arg1: i32) -> (i32, i32) {
    %c0_i32 = arith.constant 0 : i32
    %c0_i32_0 = arith.constant 0 : i32
    return %arg0, %c0_i32 : i32, i32
  }
}

</mosaic_0001>

<bundles_post_ra>
// kernel: tpu_custom_call.1
= control target key start
LH: loop header
LB: loop body
LE: loop exit
PB: predicated region body
PF: predicated region fallthrough
CT: control target
= control target key end

     0   :  { %8 = vsyncpa [#allocation4], 0  ;;  %s1478_s0 = inlined_call_operand.hbm [shape: bf16[256,64,128], index: 0, kind: input, shape index: {}]   ;;  %s1479_s1 = inlined_call_operand.hbm [shape: bf16[128,128], index: 1, kind: input, shape index: {}]   ;;  %s1480_s2 = inlined_call_operand.hbm [shape: f32[1,128], index: 2, kind: input, shape index: {}]   ;;  %s1481_s3 = inlined_call_operand.hbm [shape: f32[256,128], index: 3, kind: output, shape index: {}]  }
   0x1   :  { %10 = vsyncpa [#allocation4 + $0x1], 0 }
   0x2   :  { %11 = vsyncpa [#allocation7], 0 }
   0x3   :  { %12 = vsyncpa [#allocation5], 0 }
   0x4   :  { %14 = vsyncpa [#allocation5 + $0x1], 0  ;;  %s1192_s12 = smov 0   ;;  %s1194_s13 = smov 0  }
   0x5   :  { %s1196_s14 = smov 0   ;;  %s1198_s15 = smov 0  }
   0x6   :  { %s1200_s16 = smov 0   ;;  %s1202_s17 = smov 0  }
   0x7   :  { %s1204_s18 = smov 0   ;;  %s1206_s19 = smov 0  }
   0x8   :  { %s1208_s20 = smov 0   ;;  %s1210_s21 = smov 0  }
   0x9   :  { %s1212_s22 = smov 0  }
   0xa LB: > { %1493 = sst [smem:[#allocation16_spill]] %s1118_s12  ;;  %s720_s23 = sadd.s32 4294967295, %s1158_s22   ;;  %s1158_s22 = sphi %s1212_s22, %s20_s22   ;;  %s1154_s21 = sphi %s1210_s21, %s1528_s21   ;;  %s1150_s20 = sphi %s1208_s20, %s1527_s20   ;;  %s1146_s19 = sphi %s1206_s19, %s1526_s19   ;;  %s1142_s18 = sphi %s1204_s18, %s1525_s18   ;;  %s1138_s17 = sphi %s1202_s17, %s1524_s17   ;;  %s1134_s16 = sphi %s1200_s16, %s1523_s16   ;;  %s1130_s15 = sphi %s1198_s15, %s1522_s15   ;;  %s1126_s14 = sphi %s1196_s14, %s1516_s14   ;;  %s1122_s13 = sphi %s1194_s13, %s1521_s13   ;;  %s1118_s12 = sphi %s1192_s12, %s1520_s12  }
   0xb   : > { %1494 = sst [smem:[#allocation17_spill]] %s1126_s14  ;;  %s721_s24 = sadd.s32 4294967294, %s1158_s22  }
   0xc   : > { %s29_s25 = sadd.s32 1, %s1150_s20  ;;  %s32_s26 = sadd.s32 1, %s1154_s21 }
   0xd   : > { %p30_p0 = scmp.ge.s32.totalorder %s29_s25, 4  ;;  %s41_s27 = sadd.s32 1, %s1138_s17 }
   0xe   : > { %p48_p1 = scmp.ne.s32.totalorder %s1138_s17, %s1134_s16  ;;  %p49_p2 = scmp.eq.s32.totalorder %s1158_s22, 0 }
   0xf   : > { %s1530_s25 = smov (%p30_p0, %s29_s25), 0  ;;  %s1532_s26 = smov (!%p30_p0, %s32_s26), %s1154_s21 }
  0x10   : > { %1495 = sst [smem:[#allocation18_spill]] %s1530_s25  ;;  %s37_s28 = ssub.s32 %s1150_s20, %s1530_s25 }
  0x11   : > { %p1258_p3 = por %p49_p2, %p48_p1  ;;  %p34_p4 = scmp.ge.s32.totalorder %s1532_s26, 32 }
  0x12   : > { %p54_p5 = scmp.ne.s32.totalorder %s1134_s16, %s1130_s15  ;;  %p1263_p6 = scmp.eq.s32.totalorder %s720_s23, 0 }
  0x13   : > { %s1496_s29 = scalar_select %p1258_p3, 1, 0 }
  0x14   : > { %s1497_s30 = scalar_select %p1263_p6, 1, 0 }
  0x15   : > { %s109_s4 = sadd.s32 1, %s1126_s14  ;;  %s1534_s26 = smov (%p34_p4, %s1532_s26), 0 }
  0x16   : > { %1498 = sst [smem:[#allocation19_spill]] %s1534_s26  ;;  %p1272_p7 = por %p1263_p6, %p54_p5 }
  0x17   : > { %p119_p8 = scmp.ne.s32.totalorder %s1126_s14, %s1122_s13  ;;  %s36_s6 = ssub.s32 %s1154_s21, %s1534_s26 }
  0x18   : > { %s1499_s5 = scalar_select %p1272_p7, 1, 0 }
  0x19   : > { %p120_p9 = scmp.eq.s32.totalorder %s720_s23, 127  ;;  %s38_s7 = sor.u32 %s37_s28, %s36_s6 }
  0x1a   : > { %p107_p10 = scmp.eq.s32.totalorder %s36_s6, 0  ;;  %p39_p11 = scmp.eq.s32.totalorder %s38_s7, 0 }
  0x1b   : > { %p1280_p12 = por %p120_p9, %p119_p8  ;;  %p125_p13 = scmp.ne.s32.totalorder %s1122_s13, %s1118_s12 }
  0x1c   : > { %s1285_s9 = scalar_select %p107_p10, %s1126_s14, %s109_s4  }
  0x1d   : > { %s1500_s8 = scalar_select %p1280_p12, 1, 0 }
  0x1e   : > { %1501 = sst [smem:[#allocation20_spill]] %s1285_s9  ;;  %p126_p0 = scmp.eq.s32.totalorder %s721_s24, 127 }
  0x1f   : > { %s1288_s10 = scalar_select %p39_p11, %s1138_s17, %s41_s27  }
  0x20   : > { %p722_p1 = scmp.ge.s32.totalorder %s1158_s22, 1  ;;  %p133_p2 = scmp.lt.s32.totalorder %s1158_s22, 129 }
  0x21   : > { %1502 = sst [smem:[#allocation21_spill]] %s1288_s10  ;;  %p1294_p4 = por %p126_p0, %p125_p13 }
  0x22   : > { %p1298_p5 = pnand %p722_p1, %p133_p2  ;;  %s1160_s23 = smov [#allocation6]  }
  0x23   : > { %s1503_s11 = scalar_select %p1294_p4, 1, 0 }
  0x24   : > { %s1505_s15 = scalar_select %p1298_p5, 1, 0 }
  0x25   : > { %1504 = sst [smem:[#allocation22_spill]] %s1503_s11  ;;  %s145_s28 = sshll.u32 %s1160_s23, 4  ;;  %s146_s28 = int_to_ptr.vmem [resolvable:$true] %s145_s28 }
  0x26   : > { %p845_p8 = pneg %p1298_p5  ;;  %s1161_s24 = smov [#allocation8]  }
  0x27   : > { %s159_s4 = sshll.u32 %s1161_s24, 4  ;;  %s976_s26 = scalar_lea.hbm %s1479_s1, 1024  ;;  %s1310_s4 = int_to_ptr.vmem [resolvable:$true] %s159_s4 }
  0x28   : > { %p1306_p9 = pnand %p845_p8, %p1263_p6  ;;  %p977_p10 = scmp.ne.s32.totalorder %s1479_s1, %s976_s26 }
  0x29   : > { %p983_p1 = scmp.lt.u32.totalorder %s976_s26, %s1479_s1 }
  0x2a   : > { %p978_p11 = pneg %p1306_p9 }
  0x2c   : > { %p979_p13 = pnand %p978_p11, %p977_p10 }
  0x2e   : > { %p980_p0 = pneg %p979_p13 }
  0x30   : > { %p985_p2 = pnand %p983_p1, %p980_p0 }
  0x32   : > { %988 = shalt.err (!%p985_p2)
}
  0x33   : > { %s989_s24 = scalar_lea.vmem %s146_s28, 1024  ;;  %p997_p6 = scmp.lt.s32.totalorder %s146_s28, %s146_s28 }
  0x34   : > { %p990_p8 = scmp.ne.s32.totalorder %s146_s28, %s989_s24  ;;  %p998_p7 = scmp.lt.s32.totalorder %s989_s24, %s989_s24 }
  0x36   : > { %p992_p4 = pnand %p990_p8, %p978_p11  ;;  %p999_p5 = por %p998_p7, %p997_p6 }
  0x38   : > { %p993_p12 = pneg %p992_p4 }
  0x3a   : > { %p1000_p3 = pnand %p999_p5, %p993_p12 }
  0x3c   : > { %1003 = shalt.err (!%p1000_p3)
}
  0x3d   : > { %s1162_s25 = smov 64   ;;  %s1163_s6 = smov 4  }
  0x3e   : > { %848 = dma.hbm_to_vmem [thread:$0]  (!%p1306_p9), %s1479_s1, 1024, %s146_s28, [#allocation7], %s1162_s25, %s1162_s25, %s1163_s6  }
  0x3f   : > { %s1004_s23 = scalar_lea.hbm %s1480_s2, 16 }
  0x40   : > { %p1005_p4 = scmp.ne.s32.totalorder %s1480_s2, %s1004_s23  ;;  %p1011_p7 = scmp.lt.u32.totalorder %s1004_s23, %s1480_s2 }
  0x42   : > { %p1007_p3 = pnand %p1005_p4, %p978_p11 }
  0x44   : > { %p1008_p6 = pneg %p1007_p3 }
  0x46   : > { %p1013_p12 = pnand %p1011_p7, %p1008_p6 }
  0x48   : > { %1016 = shalt.err (!%p1013_p12)
}
  0x49   : > { %s1017_s28 = scalar_lea.vmem %s1310_s4, 16  ;;  %s1024_s14 = scalar_lea.vmem %s1310_s4, 32 }
  0x4a   : > { %p1018_p5 = scmp.ne.s32.totalorder %s1310_s4, %s1017_s28  ;;  %p1025_p0 = scmp.lt.s32.totalorder %s1310_s4, %s1310_s4 }
  0x4b   : > { %p1026_p1 = scmp.lt.s32.totalorder %s1024_s14, %s1017_s28 }
  0x4c   : > { %p1020_p10 = pnand %p1018_p5, %p978_p11 }
  0x4d   : > { %p1027_p2 = por %p1026_p1, %p1025_p0 }
  0x4e   : > { %p1021_p13 = pneg %p1020_p10 }
  0x50   : > { %p1028_p8 = pnand %p1027_p2, %p1021_p13 }
  0x52   : > { %1031 = shalt.err (!%p1028_p8)
}
  0x53   : > { %851 = dma.hbm_to_vmem [thread:$0]  (!%p1306_p9), %s1480_s2, 16, %s1310_s4, [#allocation7]  }
  0x54   : > { %p725_p4 = scmp.ge.s32.totalorder %s1158_s22, 128 }
  0x56   : > { %166 = sbr.rel (%p725_p4) target bundleno = 110 (0x6e), region = 24 }
  0x5d   : > { %s170_s25 = sand.u32 1, %s1138_s17   ;;  %s728_s6 = sshll.u32 %s1150_s20, 1 }
  0x5e   : > { %s726_s26 = sshll.u32 %s170_s25, 6  ;;  %s761_s27 = sshll.u32 %s1154_s21, 6 }
  0x5f   : > { %s181_s9 = sadd.s32 %s761_s27, %s728_s6  ;;  %s174_s10 = scalar_lea.vmem [#allocation3], %s726_s26 }
  0x60   : > { %s196_s7 = sshll.u32 %s174_s10, 4  ;;  %s730_s4 = sshll.u32 %s181_s9, 6  ;;  %s197_s7 = int_to_ptr.vmem [resolvable:$true] %s196_s7 }
  0x61   : > { %p1507_p9 = scmp.ne.s32.totalorder %s1496_s29, 0  ;;  %s1164_s24 = smov 512  }
  0x62   : > { %s1165_s14 = smov 128   ;;  %s1166_s12 = smov 2  }
  0x63   : > { %s830_s23 = scalar_select %p1507_p9, [#allocation0], [#allocation12] }
  0x64   : > { %831 = sst [smem:[#allocation11]] (%p1507_p9), %s1164_s24  ;;  %s1167_s11 = smov 64  }
  0x65   : > { %s188_s28 = sld [smem:[%s830_s23]]   ;;  %s183_s27 = scalar_lea.hbm %s1478_s0, %s730_s4 }
  0x66   : > { %832 = sst [smem:[#allocation11 + $0x1]] (%p1507_p9), %s1165_s14  ;;  %s1168_s9 = smov 4  }
  0x67   : > { %833 = sst [smem:[#allocation11 + $0x2]] (%p1507_p9), %s1166_s12  ;;  %s171_s24 = scalar_lea.sflag [#allocation4], %s170_s25 }
  0x68   : > { %834 = sst [smem:[#allocation11 + $0x3]] (%p1507_p9), %s1167_s11  ;;  %s1169_s14 = smov [#allocation10]  }
  0x69   : > { %835 = sst [smem:[#allocation11 + $0x4]] (%p1507_p9), %s1167_s11 }
  0x6a   : > { %836 = sst [smem:[#allocation11 + $0x5]] (%p1507_p9), %s1168_s9 }
  0x6b   : > { %s731_s10 = sshll.u32 %s188_s28, 26 }
  0x6c   : > { %s732_s23 = sadd.s32 134217728, %s731_s10 }
  0x6d   : > { %837 = dma.general (%p1507_p9), %s183_s27, 1024, %s197_s7, %s171_s24, %s1169_s14, [#allocation11], %s732_s23, 0  }
  0x6e PF: > { %p1508_p11 = scmp.ne.s32.totalorder %s1505_s15, 0 }
  0x6f   : > { %s223_s12 = sand.u32 (!%p1508_p11), 1, %s1134_s16   ;;  %p1509_p3 = scmp.ne.s32.totalorder (!%p1508_p11), %s1499_s5, 0 }
  0x70   : > { %221 = sbr.rel (%p1508_p11) target bundleno = 450 (0x1c2), region = 32  ;;  %s734_s6 = sshll.u32 (!%p1508_p11), %s223_s12, 6 }
  0x71   : > { %s224_s4 = scalar_lea.sflag (!%p1508_p11), [#allocation4], %s223_s12  ;;  %s1386_s26 = scalar_lea.vmem (!%p1508_p11), [#allocation3], %s734_s6 }
  0x77   : > { %1105 = dma.done.wait (%p1509_p3), %s224_s4, 1024  }
  0x78   : > { %1107 = vsyncadd (%p1509_p3), %s224_s4, 4294966272  ;;  %p1510_p6 = scmp.ne.s32.totalorder %s1497_s30, 0 }
  0x7a   : > { %1109 = dma.done.wait (%p1510_p6), [#allocation7], 1040  }
  0x7b   : > { %1111 = vsyncadd (%p1510_p6), [#allocation7], 4294966256  ;;  %s255_s29 = sand.u32 1, %s1122_s13   ;;  %p738_p7 = scmp.ne.s32.totalorder %s1142_s18, 0 }
  0x7c   : > { %s1399_s15 = sshll.u32 %s255_s29, 3  ;;  %v1170_v0 = vmov (!%p738_p7), 0.0  }
  0x7d   : > { %s257_s25 = scalar_lea.vmem [#allocation9], %s1399_s15  ;;  %264 = sbr.rel (%p738_p7) target bundleno = 132 (0x84), region = 48  ;;  %265 = vst [vmem:[#allocation2] sm:$0xff] (!%p738_p7), %v1170_v0 }
  0x84 PF: > { %v960_v1 = vld [vmem:[#allocation6] sm:$0xff]   ;;  %v961_v2 = vld [vmem:[#allocation6 + $0x8] sm:$0xff]   ;;  %v962_v3 = vld [vmem:[#allocation6 + $0x10] sm:$0xff]   ;;  %vm579_vm0 = vcmask 1041409   ;;  %vm581_vm1 = vcmask 1042434   ;;  %vm583_vm2 = vcmask 1043459  }
  0x85   : > { %778 = vmatprep.subr.bf16.mxu0 %v960_v1  ;;  %810 = vmatprep.subr.bf16.mxu1 %v960_v1  ;;  %v963_v4 = vld [vmem:[#allocation6 + $0x18] sm:$0xff]   ;;  %v968_v5 = vld [vmem:[%s1386_s26] sm:$0xff]   ;;  %v965_v8 = vld [vmem:[#allocation6 + $0x28] sm:$0xff]   ;;  %vm585_vm3 = vcmask 1044484   ;;  %vm587_vm4 = vcmask 1045509   ;;  %vm589_vm5 = vcmask 1046534  }
  0x86   : > { %779 = vmatpush3.bf16.msra.mxu0 %v960_v1  ;;  %818 = vmatpush3.bf16.msra.mxu1 %v960_v1  ;;  %v969_v6 = vld [vmem:[%s1386_s26 + $0x20] sm:$0xff]   ;;  %v966_v9 = vld [vmem:[#allocation6 + $0x30] sm:$0xff]   ;;  %v967_v10 = vld [vmem:[#allocation6 + $0x38] sm:$0xff]   ;;  %vm591_vm6 = vcmask 1047559   ;;  %p756_p12 = scmp.ne.s32.totalorder %s1142_s18, 3 }
  0x87   : > { %780 = vmatprep.subr.bf16.mxu0 %v961_v2  ;;  %811 = vmatprep.subr.bf16.mxu1 %v961_v2  ;;  %v964_v7 = vld [vmem:[#allocation6 + $0x20] sm:$0xff]   ;;  %v970_v11 = vld [vmem:[%s1386_s26 + $0x8] sm:$0xff]   ;;  %v972_v13 = vld [vmem:[%s1386_s26 + $0x10] sm:$0xff]  }
  0x88   : > { %794 = vmatprep.mubr.bf16.mxu0 %v968_v5  ;;  %802 = vmatprep.mubr.bf16.mxu1 %v969_v6  ;;  %v971_v12 = vld [vmem:[%s1386_s26 + $0x28] sm:$0xff]   ;;  %v973_v14 = vld [vmem:[%s1386_s26 + $0x30] sm:$0xff]   ;;  %v974_v15 = vld [vmem:[%s1386_s26 + $0x18] sm:$0xff]  }
  0x89   : > { %v975_v16 = vld [vmem:[%s1386_s26 + $0x38] sm:$0xff]   ;;  %v739_v17 = vld [vmem:[#allocation8] ss:$0 sm:$0xff] }
  0x8a   : > { %781 = vmatpush3.bf16.msra.mxu0 %v961_v2  ;;  %819 = vmatpush3.bf16.msra.mxu1 %v961_v2 }
  0x8b   : > { %782 = vmatprep.subr.bf16.mxu0 %v962_v3  ;;  %812 = vmatprep.subr.bf16.mxu1 %v962_v3 }
  0x8e   : > { %783 = vmatpush3.bf16.msra.mxu0 %v962_v3  ;;  %820 = vmatpush3.bf16.msra.mxu1 %v962_v3 }
  0x8f   : > { %784 = vmatprep.subr.bf16.mxu0 %v963_v4  ;;  %813 = vmatprep.subr.bf16.mxu1 %v963_v4 }
  0x92   : > { %785 = vmatpush3.bf16.msra.mxu0 %v963_v4  ;;  %821 = vmatpush3.bf16.msra.mxu1 %v963_v4 }
  0x93   : > { %786 = vmatprep.subr.bf16.mxu0 %v964_v7  ;;  %814 = vmatprep.subr.bf16.mxu1 %v964_v7 }
  0x96   : > { %787 = vmatpush3.bf16.msra.mxu0 %v964_v7  ;;  %822 = vmatpush3.bf16.msra.mxu1 %v964_v7 }
  0x97   : > { %788 = vmatprep.subr.bf16.mxu0 %v965_v8  ;;  %815 = vmatprep.subr.bf16.mxu1 %v965_v8 }
  0x9a   : > { %789 = vmatpush3.bf16.msra.mxu0 %v965_v8  ;;  %823 = vmatpush3.bf16.msra.mxu1 %v965_v8 }
  0x9b   : > { %790 = vmatprep.subr.bf16.mxu0 %v966_v9  ;;  %816 = vmatprep.subr.bf16.mxu1 %v966_v9 }
  0x9e   : > { %791 = vmatpush3.bf16.msra.mxu0 %v966_v9  ;;  %824 = vmatpush3.bf16.msra.mxu1 %v966_v9 }
  0x9f   : > { %792 = vmatprep.subr.bf16.mxu0 %v967_v10  ;;  %817 = vmatprep.subr.bf16.mxu1 %v967_v10 }
  0xa2   : > { %793 = vmatpush3.bf16.msra.mxu0 %v967_v10  ;;  %825 = vmatpush3.bf16.msra.mxu1 %v967_v10 }
  0xa5   : > { %795 = vmatmul.mubr.bf16.vlgmr.msra.gmra.mrb[0].mxu0 %v970_v11  ;;  %803 = vmatmul.mubr.bf16.vlgmr.msra.gmra.mrb[0].mxu1 %v971_v12 }
  0xa6   : > { %798 = vmatprep.mubr.bf16.mxu0 %v972_v13  ;;  %806 = vmatprep.mubr.bf16.mxu1 %v973_v14 }
  0xad   : > { %799 = vmatmul.mubr.bf16.gmra.mrb[4].mxu0 %v974_v15  ;;  %807 = vmatmul.mubr.bf16.gmra.mrb[4].mxu1 %v975_v16 }
 0x178   : > { %v796_v18 = vpop.f32.mrb[0].mxu0  ;;  %v804_v19 = vpop.f32.mrb[0].mxu1 }
 0x179   : > { %v444_v20 = vadd.f32 %v796_v18, %v739_v17  ;;  %v476_v21 = vadd.f32 %v804_v19, %v739_v17  ;;  %v435_v22 = vpop.f32.mrb[1].mxu0  ;;  %v467_v23 = vpop.f32.mrb[1].mxu1 }
 0x17a   : > { %v436_v24 = vadd.f32 %v739_v17, %v435_v22  ;;  %v468_v25 = vadd.f32 %v739_v17, %v467_v23  ;;  %v797_v26 = vpop.f32.mrb[2].mxu0  ;;  %v805_v27 = vpop.f32.mrb[2].mxu1 }
 0x17b   : > { %v508_v28 = vmax.f32 %v476_v21, 0.0  ;;  %v447_v29 = vadd.f32 %v797_v26, %v739_v17  ;;  %v479_v30 = vadd.f32 %v805_v27, %v739_v17  ;;  %v438_v31 = vpop.f32.mrb[3].mxu0  ;;  %v470_v32 = vpop.f32.mrb[3].mxu1  ;;  %v500_v36 = vmax.f32 %v444_v20, 0.0 }
 0x17c   : > { %v506_v33 = vmax.f32 %v468_v25, 0.0  ;;  %v439_v34 = vadd.f32 %v739_v17, %v438_v31  ;;  %v471_v35 = vadd.f32 %v739_v17, %v470_v32  ;;  %v498_v39 = vmax.f32 %v436_v24, 0.0 }
 0x17d   : > { %v501_v37 = vmax.f32 %v447_v29, 0.0  ;;  %v509_v38 = vmax.f32 %v479_v30, 0.0 }
 0x17e   : > { %v499_v40 = vmax.f32 %v439_v34, 0.0  ;;  %v507_v41 = vmax.f32 %v471_v35, 0.0 }
 0x17f   : > { %v522_v42 = vadd.f32 %v501_v37, %v500_v36  ;;  %v550_v43 = vadd.f32 %v509_v38, %v508_v28 }
 0x180   : > { %v515_v44 = vadd.f32 %v499_v40, %v498_v39  ;;  %v543_v45 = vadd.f32 %v507_v41, %v506_v33  ;;  %v800_v46 = vpop.f32.mrb[4].mxu0  ;;  %v808_v47 = vpop.f32.mrb[4].mxu1 }
 0x181   : > { %v523_v48 = vrot.slane %v522_v42, 4  ;;  %v460_v49 = vadd.f32 %v800_v46, %v739_v17  ;;  %v492_v50 = vadd.f32 %v808_v47, %v739_v17  ;;  %v451_v51 = vpop.f32.mrb[5].mxu0  ;;  %v483_v52 = vpop.f32.mrb[5].mxu1  ;;  %v551_v61 = vrot.slane %v550_v43, 4 }
 0x182   : > { %v516_v53 = vrot.slane %v515_v44, 4  ;;  %v484_v54 = vadd.f32 %v739_v17, %v483_v52  ;;  %v801_v55 = vpop.f32.mrb[6].mxu0  ;;  %v809_v56 = vpop.f32.mrb[6].mxu1  ;;  %v544_v58 = vrot.slane %v543_v45, 4  ;;  %v452_v0 = vadd.f32 %v739_v17, %v451_v51 }
 0x183   : > { %v524_v57 = vadd.f32 %v523_v48, %v522_v42  ;;  %v454_v59 = vpop.f32.mrb[7].mxu0  ;;  %v486_v60 = vpop.f32.mrb[7].mxu1  ;;  %v504_v63 = vmax.f32 %v460_v49, 0.0  ;;  %v512_v2 = vmax.f32 %v492_v50, 0.0  ;;  %v463_v3 = vadd.f32 %v801_v55, %v739_v17 }
 0x184   : > { %v517_v62 = vadd.f32 %v516_v53, %v515_v44  ;;  %v495_v4 = vadd.f32 %v809_v56, %v739_v17  ;;  %v510_v6 = vmax.f32 %v484_v54, 0.0  ;;  %v455_v7 = vadd.f32 %v739_v17, %v454_v59 }
 0x185   : > { %v525_v1 = vrot.slane %v524_v57, 2  ;;  %v487_v8 = vadd.f32 %v739_v17, %v486_v60  ;;  %v545_v10 = vadd.f32 %v544_v58, %v543_v45  ;;  %v505_v11 = vmax.f32 %v463_v3, 0.0 }
 0x186   : > { %v518_v5 = vrot.slane %v517_v62, 2  ;;  %v513_v12 = vmax.f32 %v495_v4, 0.0  ;;  %v502_v14 = vmax.f32 %v452_v0, 0.0  ;;  %v503_v15 = vmax.f32 %v455_v7, 0.0 }
 0x187   : > { %v526_v9 = vadd.f32 %v525_v1, %v524_v57  ;;  %v511_v16 = vmax.f32 %v487_v8, 0.0  ;;  %v552_v19 = vadd.f32 %v551_v61, %v550_v43  ;;  %v536_v20 = vadd.f32 %v505_v11, %v504_v63 }
 0x188   : > { %v519_v13 = vadd.f32 %v518_v5, %v517_v62  ;;  %v564_v21 = vadd.f32 %v513_v12, %v512_v2  ;;  %v529_v23 = vadd.f32 %v503_v15, %v502_v14  ;;  %v546_v28 = vrot.slane %v545_v10, 2  ;;  %v514_v62 = vld [vmem:[#allocation2] sm:$0xff] }
 0x189   : > { %v527_v18 = vrot.slane %v526_v9, 1  ;;  %v557_v24 = vadd.f32 %v511_v16, %v510_v6  ;;  %v537_v26 = vrot.slane %v536_v20, 4  ;;  %v553_v31 = vrot.slane %v552_v19, 2 }
 0x18a   : > { %v520_v22 = vrot.slane %v519_v13, 1  ;;  %v565_v27 = vrot.slane %v564_v21, 4  ;;  %v530_v29 = vrot.slane %v529_v23, 4  ;;  %v547_v39 = vadd.f32 %v546_v28, %v545_v10 }
 0x18b   : > { %v528_v25 = vadd.f32 %v527_v18, %v526_v9  ;;  %v558_v30 = vrot.slane %v557_v24, 4  ;;  %v538_v32 = vadd.f32 %v537_v26, %v536_v20  ;;  %v554_v42 = vadd.f32 %v553_v31, %v552_v19 }
 0x18c   : > { %v521_v17 = vadd.f32 %v520_v22, %v519_v13  ;;  %v566_v33 = vadd.f32 %v565_v27, %v564_v21  ;;  %v531_v35 = vadd.f32 %v530_v29, %v529_v23  ;;  %v548_v48 = vrot.slane %v547_v39, 1 }
 0x18d   : > { %v559_v36 = vadd.f32 %v558_v30, %v557_v24  ;;  %v539_v37 = vrot.slane %v538_v32, 2  ;;  %v555_v50 = vrot.slane %v554_v42, 1 }
 0x18e   : > { %v580_v34 = vsel %vm579_vm0, %v528_v25, %v521_v17  ;;  %v567_v38 = vrot.slane %v566_v33, 2  ;;  %v532_v40 = vrot.slane %v531_v35, 2  ;;  %v549_v55 = vadd.f32 %v548_v48, %v547_v39 }
 0x18f   : > { %v560_v41 = vrot.slane %v559_v36, 2  ;;  %v540_v43 = vadd.f32 %v539_v37, %v538_v32  ;;  %v556_v57 = vadd.f32 %v555_v50, %v554_v42 }
 0x190   : > { %v533_v44 = vadd.f32 %v532_v40, %v531_v35  ;;  %v568_v47 = vadd.f32 %v567_v38, %v566_v33 }
 0x191   : > { %v561_v45 = vadd.f32 %v560_v41, %v559_v36  ;;  %v541_v46 = vrot.slane %v540_v43, 1 }
 0x192   : > { %v534_v49 = vrot.slane %v533_v44, 1  ;;  %v569_v54 = vrot.slane %v568_v47, 1 }
 0x193   : > { %v562_v52 = vrot.slane %v561_v45, 1  ;;  %v542_v53 = vadd.f32 %v541_v46, %v540_v43 }
 0x194   : > { %v535_v51 = vadd.f32 %v534_v49, %v533_v44  ;;  %v570_v61 = vadd.f32 %v569_v54, %v568_v47 }
 0x195   : > { %v563_v59 = vadd.f32 %v562_v52, %v561_v45 }
 0x196   : > { %v582_v56 = vsel %vm581_vm1, %v535_v51, %v580_v34 }
 0x197   : > { %v584_v58 = vsel %vm583_vm2, %v542_v53, %v582_v56 }
 0x198   : > { %v586_v60 = vsel %vm585_vm3, %v549_v55, %v584_v58  ;;  %599 = sbr.rel (%p756_p12) target bundleno = 425 (0x1a9), region = 52 }
 0x199   : > { %v588_v63 = vsel %vm587_vm4, %v556_v57, %v586_v60 }
 0x19a   : > { %v590_v0 = vsel %vm589_vm5, %v563_v59, %v588_v63 }
 0x19b   : > { %v592_v1 = vsel %vm591_vm6, %v570_v61, %v590_v0 }
 0x19c   : > { %v594_v2 = vadd.f32 %v592_v1, %v514_v62 }
 0x19e   : > { %595 = vst [vmem:[#allocation2] sm:$0xff] %v594_v2 }
 0x1a5   : > { %v600_v3 = vld [vmem:[#allocation2] sm:$0xff] }
 0x1a6   : > { %v601_v4 = vmul.f32 0.015625, %v600_v3 }
 0x1a8   : > { %602 = vst [vmem:[%s257_s25] sm:$0xff] %v601_v4 }
 0x1a9 PF: > { %s758_s30 = sshll.u32 %s1146_s19, 7  ;;  %s617_s11 = sshll.u32 %s257_s25, 4  ;;  %s618_s11 = int_to_ptr.vmem [resolvable:$true] %s617_s11 }
 0x1aa   : > { %s1418_s28 = scalar_lea.hbm %s1481_s3, %s758_s30  ;;  %s604_s18 = scalar_lea.sflag [#allocation5], %s255_s29 }
 0x1ab   : > { %s1032_s27 = scalar_lea.vmem %s618_s11, 128  ;;  %p1511_p10 = scmp.ne.s32.totalorder %s1500_s8, 0 }
 0x1ac   : > { %p1033_p5 = scmp.ne.s32.totalorder %s618_s11, %s1032_s27  ;;  %s1171_s9 = smov [#allocation9]  }
 0x1ad   : > { %s1036_s10 = sshll.u32 %s1171_s9, 4  ;;  %s1037_s10 = int_to_ptr.vmem [resolvable:$false] %s1036_s10 }
 0x1ae   : > { %p1034_p13 = pnand %p1033_p5, %p1511_p10  ;;  %s1038_s23 = scalar_lea.vmem %s1037_s10, 256 }
 0x1af   : > { %p1039_p1 = scmp.lt.s32.totalorder %s618_s11, %s1037_s10  ;;  %p1040_p2 = scmp.lt.s32.totalorder %s1038_s23, %s1032_s27 }
 0x1b0   : > { %p1035_p0 = pneg %p1034_p13 }
 0x1b1   : > { %p1041_p8 = por %p1040_p2, %p1039_p1 }
 0x1b3   : > { %p1042_p4 = pnand %p1041_p8, %p1035_p0 }
 0x1b5   : > { %1045 = shalt.err (!%p1042_p4)
}
 0x1b6   : > { %s1046_s19 = scalar_lea.hbm %s1418_s28, 128  ;;  %s1050_s12 = scalar_lea.hbm %s1481_s3, 4096 }
 0x1b7   : > { %p1047_p9 = scmp.ne.s32.totalorder %s1418_s28, %s1046_s19  ;;  %p1051_p6 = scmp.lt.u32.totalorder %s1418_s28, %s1481_s3 }
 0x1b8   : > { %p1052_p7 = scmp.lt.u32.totalorder %s1050_s12, %s1046_s19  ;;  %p1054_p5 = scmp.lt.u32.totalorder %s1046_s19, %s1418_s28 }
 0x1b9   : > { %p1048_p11 = pnand %p1047_p9, %p1511_p10 }
 0x1ba   : > { %p1053_p12 = por %p1052_p7, %p1051_p6 }
 0x1bb   : > { %p1049_p3 = pneg %p1048_p11 }
 0x1bc   : > { %p1055_p13 = por %p1054_p5, %p1053_p12 }
 0x1be   : > { %p1056_p0 = pnand %p1055_p13, %p1049_p3 }
 0x1c0   : > { %1059 = shalt.err (!%p1056_p0)
}
 0x1c1   : > { %843 = dma.vmem_to_hbm [thread:$0]  (%p1511_p10), %s618_s11, 128, %s1418_s28, %s604_s18  }
 0x1c2 PF: > { %s1512_s26 = sld [smem:[#allocation16_spill]]  ;;  %s1513_s29 = sld [smem:[#allocation22_spill]] }
 0x1c3   : > { %p860_p1 = scmp.ge.s32.totalorder %s1158_s22, 2 }
 0x1c8   : > { %s629_s15 = sand.u32 1, %s1512_s26   ;;  %p1514_p2 = scmp.ne.s32.totalorder %s1513_s29, 0 }
 0x1c9   : > { %s630_s25 = scalar_lea.sflag [#allocation5], %s629_s15 }
 0x1ca   : > { %p853_p8 = pnand %p860_p1, %p1514_p2 }
 0x1cc   : > { %1113 = dma.done.wait (!%p853_p8), %s630_s25, 128  }
 0x1cd   : > { %1115 = vsyncadd (!%p853_p8), %s630_s25, 4294967168  ;;  %s20_s22 = sadd.s32 1, %s1158_s22   ;;  %s1515_s30 = sld [smem:[#allocation17_spill]] }
 0x1ce   : > { %p17_p4 = scmp.ge.s32.totalorder %s20_s22, 130   ;;  %s1516_s14 = sld [smem:[#allocation20_spill]] }
 0x1cf   : > { %s1517_s8 = sld [smem:[#allocation21_spill]]  ;;  %s1518_s5 = sld [smem:[#allocation18_spill]] }
 0x1d0   : > { %s1519_s7 = sld [smem:[#allocation19_spill]]  ;;  %s1520_s12 = smov %s1122_s13 }
 0x1d1   : > { %s1522_s15 = smov %s1134_s16  ;;  %s1523_s16 = smov %s1138_s17 }
 0x1d2   : > { %s1525_s18 = smov %s1150_s20  ;;  %s1526_s19 = smov %s1154_s21 }
 0x1d3   : > { %s1521_s13 = smov %s1515_s30  ;;  %19 = sbr.rel (!%p17_p4) target bundleno = 10 (0xa), region = 98 }
 0x1d5   : > { %s1524_s17 = smov %s1517_s8  ;;  %s1527_s20 = smov %s1518_s5 }
 0x1d6   : > { %s1528_s21 = smov %s1519_s7 }
 0x1da   :  { %635 = vsyncpa [#allocation4], 1 }
 0x1db   :  { %637 = vsyncpa [#allocation4 + $0x1], 1 }
 0x1dc   :  { %638 = vsyncpa [#allocation7], 1 }
 0x1dd   :  { %639 = vsyncpa [#allocation5], 1 }
 0x1de   :  { %641 = vsyncpa [#allocation5 + $0x1], 1 }

</bundles_post_ra>
